<compile_context>
chip_gen: v5e
topology: v5e:2x2
jax: 0.10.0
libtpu: 0.0.40
codegen_flags: <defaults>
</compile_context>

<pallas_src>
import functools

import jax
import jax.numpy as jnp
from jax.experimental import pallas as pl
from jax.experimental.pallas import tpu as pltpu


# Safe on v5e/v6e/v7x (>= v5e default 16 MiB, <= v7x physical 64 MiB); the tile
# preferences below keep per-call VMEM usage well under this with double-buffering.
_VMEM_LIMIT = 32 * 1024 * 1024


def _tile(dim, pref, align):
    """Largest tile <= pref that is a multiple of `align` and divides `dim`; else full dim."""
    if dim <= pref:
        return dim
    t = (pref // align) * align
    while t >= align:
        if dim % t == 0:
            return t
        t -= align
    return dim


# ---------------------------------------------------------------------------
# Tiled linear:  y = [relu](x @ w + b)
# ---------------------------------------------------------------------------

def _linear_kernel(x_ref, w_ref, b_ref, o_ref, acc_ref, *, relu, mxu_dtype):
    k_i = pl.program_id(2)

    @pl.when(k_i == 0)
    def _init():
        acc_ref[...] = jnp.zeros(acc_ref.shape, jnp.float32)

    acc_ref[...] += jnp.dot(x_ref[...].astype(mxu_dtype),
                            w_ref[...].astype(mxu_dtype),
                            preferred_element_type=jnp.float32)

    @pl.when(k_i == pl.num_programs(2) - 1)
    def _finalize():
        y = acc_ref[...] + b_ref[...].astype(jnp.float32)
        if relu:
            y = jnp.maximum(y, 0.0)
        o_ref[...] = y.astype(o_ref.dtype)


def linear(x, w, b, *, relu=False, mxu_dtype=jnp.bfloat16,
           tm_pref=256, tn_pref=512, tk_pref=512):
    M, K = x.shape
    N = w.shape[1]
    tm = _tile(M, tm_pref, 8)
    tn = _tile(N, tn_pref, 128)
    tk = _tile(K, tk_pref, 128)
    bytes_el = x.dtype.itemsize
    return pl.pallas_call(
        functools.partial(_linear_kernel, relu=relu, mxu_dtype=mxu_dtype),
        out_shape=jax.ShapeDtypeStruct((M, N), x.dtype),
        grid=(M // tm, N // tn, K // tk),
        in_specs=[
            pl.BlockSpec((tm, tk), lambda i, j, k: (i, k)),
            pl.BlockSpec((tk, tn), lambda i, j, k: (k, j)),
            pl.BlockSpec((1, tn), lambda i, j, k: (0, j)),
        ],
        out_specs=pl.BlockSpec((tm, tn), lambda i, j, k: (i, j)),
        scratch_shapes=[pltpu.VMEM((tm, tn), jnp.float32)],
        compiler_params=pltpu.CompilerParams(
            dimension_semantics=("parallel", "parallel", "arbitrary"),
            vmem_limit_bytes=_VMEM_LIMIT),
        cost_estimate=pl.CostEstimate(
            flops=2 * M * N * K, transcendentals=0,
            bytes_accessed=(M * K + K * N + M * N) * bytes_el),
    )(x, w, b)


# ---------------------------------------------------------------------------
# Tiled linear fused with residual-add + LayerNorm epilogue:
#   out = LayerNorm(residual + x @ w + b)      (LN over the full output width)
# ---------------------------------------------------------------------------

def _linear_res_ln_kernel(x_ref, w_ref, b_ref, res_ref, g_ref, beta_ref,
                          o_ref, acc_ref, *, eps, mxu_dtype):
    k_i = pl.program_id(1)

    @pl.when(k_i == 0)
    def _init():
        acc_ref[...] = jnp.zeros(acc_ref.shape, jnp.float32)

    acc_ref[...] += jnp.dot(x_ref[...].astype(mxu_dtype),
                            w_ref[...].astype(mxu_dtype),
                            preferred_element_type=jnp.float32)

    @pl.when(k_i == pl.num_programs(1) - 1)
    def _finalize():
        z = (acc_ref[...] + b_ref[...].astype(jnp.float32)
             + res_ref[...].astype(jnp.float32))
        mean = jnp.mean(z, axis=-1, keepdims=True)
        c = z - mean
        var = jnp.mean(c * c, axis=-1, keepdims=True)
        y = c * jax.lax.rsqrt(var + eps)
        o_ref[...] = (y * g_ref[...].astype(jnp.float32)
                      + beta_ref[...].astype(jnp.float32)).astype(o_ref.dtype)


def linear_residual_layernorm(x, w, b, residual, gamma, beta, *, eps=1e-5,
                              mxu_dtype=jnp.bfloat16, tm_pref=256, tk_pref=512):
    M, K = x.shape
    N = w.shape[1]                      # LN width: kept as one lane-dense block
    tm = _tile(M, tm_pref, 8)
    tk = _tile(K, tk_pref, 128)
    bytes_el = x.dtype.itemsize
    return pl.pallas_call(
        functools.partial(_linear_res_ln_kernel, eps=eps, mxu_dtype=mxu_dtype),
        out_shape=jax.ShapeDtypeStruct((M, N), x.dtype),
        grid=(M // tm, K // tk),
        in_specs=[
            pl.BlockSpec((tm, tk), lambda i, k: (i, k)),
            pl.BlockSpec((tk, N), lambda i, k: (k, 0)),
            pl.BlockSpec((1, N), lambda i, k: (0, 0)),
            pl.BlockSpec((tm, N), lambda i, k: (i, 0)),
            pl.BlockSpec((1, N), lambda i, k: (0, 0)),
            pl.BlockSpec((1, N), lambda i, k: (0, 0)),
        ],
        out_specs=pl.BlockSpec((tm, N), lambda i, k: (i, 0)),
        scratch_shapes=[pltpu.VMEM((tm, N), jnp.float32)],
        compiler_params=pltpu.CompilerParams(
            dimension_semantics=("parallel", "arbitrary"),
            vmem_limit_bytes=_VMEM_LIMIT),
        cost_estimate=pl.CostEstimate(
            flops=2 * M * N * K, transcendentals=0,
            bytes_accessed=(M * K + K * N + 2 * M * N) * bytes_el),
    )(x, w, b, residual, gamma, beta)


# ---------------------------------------------------------------------------
# Fused position-wise FFN + residual + LayerNorm:
#   out = LayerNorm(x + relu(x @ W1 + b1) @ W2 + b2)
# The (M, d_ff) intermediate stays in VMEM (chunked over d_ff on the grid).
# ---------------------------------------------------------------------------

def _ffn_res_ln_kernel(x_ref, w1_ref, b1_ref, w2_ref, b2_ref, g_ref, beta_ref,
                       o_ref, acc_ref, *, eps, mxu_dtype):
    j = pl.program_id(1)

    @pl.when(j == 0)
    def _init():
        acc_ref[...] = jnp.zeros(acc_ref.shape, jnp.float32)

    x = x_ref[...].astype(mxu_dtype)
    h1 = jnp.dot(x, w1_ref[...].astype(mxu_dtype), preferred_element_type=jnp.float32)
    h1 = jnp.maximum(h1 + b1_ref[...].astype(jnp.float32), 0.0)
    acc_ref[...] += jnp.dot(h1.astype(mxu_dtype), w2_ref[...].astype(mxu_dtype),
                            preferred_element_type=jnp.float32)

    @pl.when(j == pl.num_programs(1) - 1)
    def _finalize():
        z = (acc_ref[...] + b2_ref[...].astype(jnp.float32)
             + x_ref[...].astype(jnp.float32))
        mean = jnp.mean(z, axis=-1, keepdims=True)
        c = z - mean
        var = jnp.mean(c * c, axis=-1, keepdims=True)
        y = c * jax.lax.rsqrt(var + eps)
        o_ref[...] = (y * g_ref[...].astype(jnp.float32)
                      + beta_ref[...].astype(jnp.float32)).astype(o_ref.dtype)


def ffn_residual_layernorm(x, w1, b1, w2, b2, gamma, beta, *, eps=1e-5,
                           mxu_dtype=jnp.bfloat16, tm_pref=256, tf_pref=512):
    M, D = x.shape
    F = w1.shape[1]
    tm = _tile(M, tm_pref, 8)
    tf = _tile(F, tf_pref, 128)
    bytes_el = x.dtype.itemsize
    return pl.pallas_call(
        functools.partial(_ffn_res_ln_kernel, eps=eps, mxu_dtype=mxu_dtype),
        out_shape=jax.ShapeDtypeStruct((M, D), x.dtype),
        grid=(M // tm, F // tf),
        in_specs=[
            pl.BlockSpec((tm, D), lambda i, j: (i, 0)),
            pl.BlockSpec((D, tf), lambda i, j: (0, j)),
            pl.BlockSpec((1, tf), lambda i, j: (0, j)),
            pl.BlockSpec((tf, D), lambda i, j: (j, 0)),
            pl.BlockSpec((1, D), lambda i, j: (0, 0)),
            pl.BlockSpec((1, D), lambda i, j: (0, 0)),
            pl.BlockSpec((1, D), lambda i, j: (0, 0)),
        ],
        out_specs=pl.BlockSpec((tm, D), lambda i, j: (i, 0)),
        scratch_shapes=[pltpu.VMEM((tm, D), jnp.float32)],
        compiler_params=pltpu.CompilerParams(
            dimension_semantics=("parallel", "arbitrary"),
            vmem_limit_bytes=_VMEM_LIMIT),
        cost_estimate=pl.CostEstimate(
            flops=4 * M * D * F, transcendentals=0,
            bytes_accessed=(2 * M * D + 2 * D * F) * bytes_el),
    )(x, w1, b1, w2, b2, gamma, beta)


# ---------------------------------------------------------------------------
# Flash-style multi-head attention, heads packed in the lane dimension.
#   q,k: (B, S, H*dk)  v: (B, S, H*dv)  ->  (B, S, H*dv)
# ---------------------------------------------------------------------------

def _make_flash_attn_kernel(*, h, d_k, d_v, scale, has_mask, has_weights, mxu_dtype):
    def kernel(*refs):
        q_ref, k_ref, v_ref = refs[0], refs[1], refs[2]
        idx = 3
        mask_ref = None
        w_ref = None
        if has_mask:
            mask_ref = refs[idx]
            idx += 1
        if has_weights:
            w_ref = refs[idx]
            idx += 1
        o_ref, m_sc, l_sc, acc_sc = refs[idx], refs[idx + 1], refs[idx + 2], refs[idx + 3]

        kv_i = pl.program_id(2)

        @pl.when(kv_i == 0)
        def _init():
            m_sc[...] = jnp.full(m_sc.shape, -jnp.inf, jnp.float32)
            l_sc[...] = jnp.zeros(l_sc.shape, jnp.float32)
            acc_sc[...] = jnp.zeros(acc_sc.shape, jnp.float32)

        # 1/sqrt(d_k) folded into q: O(tq*h*dk) instead of an O(tq*tkv) score multiply.
        q_all = q_ref[0].astype(jnp.float32) * scale           # (tq, h*dk)
        k_all = k_ref[0]                                       # (tkv, h*dk)
        v_all = v_ref[0]                                       # (tkv, h*dv)
        if has_mask:
            mvals = mask_ref[0, 0].astype(jnp.float32)         # (1 or tq, tkv)

        for head in range(h):
            qh = q_all[:, head * d_k:(head + 1) * d_k].astype(mxu_dtype)
            kh = k_all[:, head * d_k:(head + 1) * d_k].astype(mxu_dtype)
            vh = v_all[:, head * d_v:(head + 1) * d_v].astype(mxu_dtype)

            s = jax.lax.dot_general(                           # (tq, tkv) logits
                qh, kh, dimension_numbers=(((1,), (1,)), ((), ())),
                preferred_element_type=jnp.float32)
            if has_weights:
                s = s * w_ref[0, head].astype(jnp.float32)
            if has_mask:
                # NOTE: -1e30 stands in for torch's -inf masked_fill; a fully masked
                # row yields a uniform distribution instead of NaN (padding-mask safe).
                s = jnp.where(mvals > 0.0, jnp.float32(-1e30), s)

            m_prev = m_sc[head]                                # (tq, 1)
            m_new = jnp.maximum(m_prev, jnp.max(s, axis=-1, keepdims=True))
            alpha = jnp.exp(m_prev - m_new)
            p = jnp.exp(s - m_new)
            l_sc[head] = alpha * l_sc[head] + jnp.sum(p, axis=-1, keepdims=True)
            acc_sc[head] = alpha * acc_sc[head] + jnp.dot(
                p.astype(mxu_dtype), vh, preferred_element_type=jnp.float32)
            m_sc[head] = m_new

        @pl.when(kv_i == pl.num_programs(2) - 1)
        def _finalize():
            outs = []
            for head in range(h):
                inv = pl.reciprocal(l_sc[head], approx=True)   # EUP slot, ~free
                outs.append(acc_sc[head] * inv)
            # Lane-dense (tq, h*dv) output slab -> unmasked stores + dense DMA.
            o_ref[0] = jnp.concatenate(outs, axis=-1).astype(o_ref.dtype)

    return kernel


def mh_flash_attention(q, k, v, mask, weights, *, h, d_k, d_v,
                       mxu_dtype=jnp.bfloat16, tq_pref=256, tkv_pref=512):
    B, S, _ = q.shape
    tq = _tile(S, tq_pref, 8)
    tkv = _tile(S, tkv_pref, 128)
    scale = 1.0 / float(d_k) ** 0.5

    in_specs = [
        pl.BlockSpec((1, tq, h * d_k), lambda b, qi, ki: (b, qi, 0)),
        pl.BlockSpec((1, tkv, h * d_k), lambda b, qi, ki: (b, ki, 0)),
        pl.BlockSpec((1, tkv, h * d_v), lambda b, qi, ki: (b, ki, 0)),
    ]
    args = [q, k, v]
    has_mask = mask is not None
    has_weights = weights is not None
    if has_mask:
        if mask.shape[2] == 1:      # key-padding row: broadcast over queries in-kernel
            in_specs.append(pl.BlockSpec((1, 1, 1, tkv), lambda b, qi, ki: (b, 0, 0, ki)))
        else:                       # full (B,1,S,S) mask
            in_specs.append(pl.BlockSpec((1, 1, tq, tkv), lambda b, qi, ki: (b, 0, qi, ki)))
        args.append(mask)
    if has_weights:
        in_specs.append(pl.BlockSpec((1, h, tq, tkv), lambda b, qi, ki: (b, 0, qi, ki)))
        args.append(weights)

    kernel = _make_flash_attn_kernel(h=h, d_k=d_k, d_v=d_v, scale=scale,
                                     has_mask=has_mask, has_weights=has_weights,
                                     mxu_dtype=mxu_dtype)
    return pl.pallas_call(
        kernel,
        out_shape=jax.ShapeDtypeStruct((B, S, h * d_v), q.dtype),
        grid=(B, S // tq, S // tkv),
        in_specs=in_specs,
        out_specs=pl.BlockSpec((1, tq, h * d_v), lambda b, qi, ki: (b, qi, 0)),
        scratch_shapes=[
            pltpu.VMEM((h, tq, 1), jnp.float32),     # running max
            pltpu.VMEM((h, tq, 1), jnp.float32),     # running sum
            pltpu.VMEM((h, tq, d_v), jnp.float32),   # output accumulator
        ],
        compiler_params=pltpu.CompilerParams(
            dimension_semantics=("parallel", "parallel", "arbitrary"),
            vmem_limit_bytes=_VMEM_LIMIT),
        cost_estimate=pl.CostEstimate(
            flops=2 * B * h * S * S * (d_k + d_v),
            transcendentals=B * h * S * S,
            bytes_accessed=(q.size + k.size + v.size + B * S * h * d_v) * q.dtype.itemsize),
    )(*args)


# ---------------------------------------------------------------------------
# EncoderLayer_Box forward (glue in plain JAX, hot paths in Pallas)
# ---------------------------------------------------------------------------

def init_params(key, d_model, d_k, d_v, h, d_ff, dtype=jnp.float32):
    ks = jax.random.split(key, 6)

    def w(kk, shape):
        return (0.02 * jax.random.normal(kk, shape)).astype(dtype)

    return dict(
        wq=w(ks[0], (d_model, h * d_k)), bq=jnp.zeros((1, h * d_k), dtype),
        wk=w(ks[1], (d_model, h * d_k)), bk=jnp.zeros((1, h * d_k), dtype),
        wv=w(ks[2], (d_model, h * d_v)), bv=jnp.zeros((1, h * d_v), dtype),
        wo=w(ks[3], (h * d_v, d_model)), bo=jnp.zeros((1, d_model), dtype),
        ln1_g=jnp.ones((1, d_model), dtype), ln1_b=jnp.zeros((1, d_model), dtype),
        w1=w(ks[4], (d_model, d_ff)), b1=jnp.zeros((1, d_ff), dtype),
        w2=w(ks[5], (d_ff, d_model)), b2=jnp.zeros((1, d_model), dtype),
        ln2_g=jnp.ones((1, d_model), dtype), ln2_b=jnp.zeros((1, d_model), dtype),
    )


def encoder_layer_box_forward(params, queries, keys, values,
                              attention_mask=None, attention_weights=None,
                              pos=None, *, h, d_k, d_v, mxu_dtype=jnp.bfloat16):
    B, S, D = queries.shape

    if pos is not None:
        queries = queries + pos
        keys = keys + pos

    q2d = queries.reshape(B * S, D)
    k2d = keys.reshape(B * S, D)
    v2d = values.reshape(B * S, D)

    # Q/K/V projections (tiled MXU kernels); heads stay packed in the lane dim,
    # so the reshapes below are free (no HBM transposes).
    qp = linear(q2d, params["wq"], params["bq"], mxu_dtype=mxu_dtype).reshape(B, S, h * d_k)
    kp = linear(k2d, params["wk"], params["bk"], mxu_dtype=mxu_dtype).reshape(B, S, h * d_k)
    vp = linear(v2d, params["wv"], params["bv"], mxu_dtype=mxu_dtype).reshape(B, S, h * d_v)

    mask = None
    if attention_mask is not None:
        m = jnp.asarray(attention_mask).astype(jnp.float32)
        if m.ndim != 4:
            raise ValueError("attention_mask must be rank-4: (B,1,{1|S},S)")
        mask = jnp.broadcast_to(m, (B, 1, m.shape[2], S))
    weights = None
    if attention_weights is not None:
        weights = jnp.broadcast_to(
            jnp.asarray(attention_weights).astype(jnp.float32), (B, h, S, S))

    att = mh_flash_attention(qp, kp, vp, mask, weights,
                             h=h, d_k=d_k, d_v=d_v, mxu_dtype=mxu_dtype)   # (B,S,h*dv)
    att2d = att.reshape(B * S, h * d_v)

    # Output projection fused with residual (queries+pos) + LayerNorm1. Dropout = identity.
    mha = linear_residual_layernorm(att2d, params["wo"], params["bo"], q2d,
                                    params["ln1_g"], params["ln1_b"],
                                    mxu_dtype=mxu_dtype)                   # (B*S, D)

    # FFN: W1 + ReLU + W2 + residual + LayerNorm2 in one kernel
    # (the (B*S, d_ff) intermediate never leaves VMEM). Dropout = identity.
    ff = ffn_residual_layernorm(mha, params["w1"], params["b1"],
                                params["w2"], params["b2"],
                                params["ln2_g"], params["ln2_b"],
                                mxu_dtype=mxu_dtype)                       # (B*S, D)

    return ff.reshape(B, S, D)


# ---------------------------------------------------------------------------
# Pure-JAX reference (mirrors the PyTorch module, eval mode) for a sanity check.
# ---------------------------------------------------------------------------

def _reference_forward(params, queries, keys, values, attention_mask,
                       attention_weights, pos, *, h, d_k, d_v):
    B, S, D = queries.shape
    if pos is not None:
        queries = queries + pos
        keys = keys + pos

    def lin(x, w, b):
        return x @ w + b

    q = lin(queries, params["wq"], params["bq"]).reshape(B, S, h, d_k).transpose(0, 2, 1, 3)
    k = lin(keys, params["wk"], params["bk"]).reshape(B, S, h, d_k).transpose(0, 2, 1, 3)
    v = lin(values, params["wv"], params["bv"]).reshape(B, S, h, d_v).transpose(0, 2, 1, 3)

    att = jnp.einsum("bhqd,bhkd->bhqk", q, k) / jnp.sqrt(jnp.float32(d_k))
    if attention_weights is not None:
        att = att * attention_weights
    if attention_mask is not None:
        att = jnp.where(attention_mask > 0, -1e30, att)
    att = jax.nn.softmax(att, axis=-1)
    out = jnp.einsum("bhqk,bhkd->bhqd", att, v).transpose(0, 2, 1, 3).reshape(B, S, h * d_v)

    def ln(z, g, b):
        mu = z.mean(-1, keepdims=True)
        var = ((z - mu) ** 2).mean(-1, keepdims=True)
        return (z - mu) * jax.lax.rsqrt(var + 1e-5) * g + b

    mha = ln(queries + lin(out, params["wo"], params["bo"]),
             params["ln1_g"], params["ln1_b"])
    hid = jnp.maximum(mha @ params["w1"] + params["b1"], 0.0)
    return ln(mha + hid @ params["w2"] + params["b2"], params["ln2_g"], params["ln2_b"])


# ---------------------------------------------------------------------------

if __name__ == "__main__":
    B, S = 2, 8
    d_model, d_k, d_v, h, d_ff = 32, 8, 8, 4, 64

    key = jax.random.PRNGKey(0)
    kp, kq, kk, kv, kpos = jax.random.split(key, 5)

    params = init_params(kp, d_model, d_k, d_v, h, d_ff)
    queries = jax.random.normal(kq, (B, S, d_model), jnp.float32)
    keys = jax.random.normal(kk, (B, S, d_model), jnp.float32)
    values = jax.random.normal(kv, (B, S, d_model), jnp.float32)
    pos = jax.random.normal(kpos, (B, S, d_model), jnp.float32)

    # Key-padding mask (1 = masked): mask the last two key positions of batch 1.
    mask = jnp.zeros((B, 1, 1, S), jnp.float32).at[1, :, :, -2:].set(1.0)

    out = encoder_layer_box_forward(
        params, queries, keys, values,
        attention_mask=mask, attention_weights=None, pos=pos,
        h=h, d_k=d_k, d_v=d_v)
    jax.block_until_ready(out)

    ref = _reference_forward(params, queries, keys, values, mask, None, pos,
                             h=h, d_k=d_k, d_v=d_v)

    assert out.shape == (B, S, d_model)
    assert bool(jnp.all(jnp.isfinite(out)))
    # Loose tolerance: kernels use bf16 MXU operands + approximate reciprocal.
    assert bool(jnp.allclose(out, ref, atol=0.1, rtol=0.1))
    print("KERNEL_OK")
</pallas_src>

<mosaic_0001>
module attributes {stable_mosaic.version = 11 : i64} {
  func.func @_linear_kernel(%arg0: i32, %arg1: i32, %arg2: i32, %arg3: memref<16x32xf32, #tpu.memory_space<vmem>>, %arg4: memref<32x32xf32, #tpu.memory_space<vmem>>, %arg5: memref<1x32xf32, #tpu.memory_space<vmem>>, %arg6: memref<16x32xf32, #tpu.memory_space<vmem>>, %arg7: memref<16x32xf32, #tpu.memory_space<vmem>>) attributes {dimension_semantics = [#tpu.dimension_semantics<parallel>, #tpu.dimension_semantics<parallel>, #tpu.dimension_semantics<arbitrary>], iteration_bounds = array<i64: 1, 1, 1>, scalar_prefetch = 0 : i64, scratch_operands = 1 : i64, tpu.core_type = #tpu.core_type<tc>, window_params = [{transform_indices = @transform_0, window_bounds = array<i64: 16, 32>}, {transform_indices = @transform_1, window_bounds = array<i64: 32, 32>}, {transform_indices = @transform_2, window_bounds = array<i64: 1, 32>}, {transform_indices = @transform_3, window_bounds = array<i64: 16, 32>}]} {
    %c0_i32 = arith.constant 0 : i32
    %0 = arith.cmpi eq, %arg2, %c0_i32 : i32
    %1 = arith.extui %0 : i1 to i32
    %c0_i32_0 = arith.constant 0 : i32
    %2 = arith.cmpi ne, %1, %c0_i32_0 : i32
    scf.if %2 {
      %cst_10 = arith.constant 0.000000e+00 : f32
      %14 = vector.broadcast %cst_10 : f32 to vector<16x32xf32>
      %c0_11 = arith.constant 0 : index
      %c0_12 = arith.constant 0 : index
      %15 = vector.load %arg7[%c0_11, %c0_12] : memref<16x32xf32, #tpu.memory_space<vmem>>, vector<16x32xf32>
      tpu.vector_store %arg7[%c0_11, %c0_12], %14 {strides = array<i32>} : memref<16x32xf32, #tpu.memory_space<vmem>>, vector<16x32xf32>,
    } else {
    }
    %c0 = arith.constant 0 : index
    %c0_1 = arith.constant 0 : index
    %3 = vector.load %arg7[%c0, %c0_1] : memref<16x32xf32, #tpu.memory_space<vmem>>, vector<16x32xf32>
    %c0_2 = arith.constant 0 : index
    %c0_3 = arith.constant 0 : index
    %4 = vector.load %arg3[%c0_2, %c0_3] : memref<16x32xf32, #tpu.memory_space<vmem>>, vector<16x32xf32>
    %5 = arith.truncf %4 : vector<16x32xf32> to vector<16x32xbf16>
    %c0_4 = arith.constant 0 : index
    %c0_5 = arith.constant 0 : index
    %6 = vector.load %arg4[%c0_4, %c0_5] : memref<32x32xf32, #tpu.memory_space<vmem>>, vector<32x32xf32>
    %7 = arith.truncf %6 : vector<32x32xf32> to vector<32x32xbf16>
    %cst = arith.constant dense<0.000000e+00> : vector<16x32xf32>
    %8 = tpu.matmul %5, %7, %cst {dimension_numbers = #tpu.dot_dimension_numbers<[1], [0], [0], [1], [0, 0, 1, 1], [], []>} : vector<16x32xbf16>, vector<32x32xbf16>, vector<16x32xf32> -> vector<16x32xf32>
    %9 = arith.addf %3, %8 : vector<16x32xf32>
    %c0_6 = arith.constant 0 : index
    %c0_7 = arith.constant 0 : index
    %10 = vector.load %arg7[%c0_6, %c0_7] : memref<16x32xf32, #tpu.memory_space<vmem>>, vector<16x32xf32>
    tpu.vector_store %arg7[%c0_6, %c0_7], %9 {strides = array<i32>} : memref<16x32xf32, #tpu.memory_space<vmem>>, vector<16x32xf32>,
    %c0_i32_8 = arith.constant 0 : i32
    %11 = arith.cmpi eq, %arg2, %c0_i32_8 : i32
    %12 = arith.extui %11 : i1 to i32
    %c0_i32_9 = arith.constant 0 : i32
    %13 = arith.cmpi ne, %12, %c0_i32_9 : i32
    scf.if %13 {
      %c0_10 = arith.constant 0 : index
      %c0_11 = arith.constant 0 : index
      %14 = vector.load %arg7[%c0_10, %c0_11] : memref<16x32xf32, #tpu.memory_space<vmem>>, vector<16x32xf32>
      %c0_12 = arith.constant 0 : index
      %c0_13 = arith.constant 0 : index
      %15 = vector.load %arg5[%c0_12, %c0_13] : memref<1x32xf32, #tpu.memory_space<vmem>>, vector<1x32xf32>
      %16 = vector.broadcast %15 : vector<1x32xf32> to vector<16x32xf32>
      %17 = arith.addf %14, %16 : vector<16x32xf32>
      %c0_14 = arith.constant 0 : index
      %c0_15 = arith.constant 0 : index
      %18 = vector.load %arg6[%c0_14, %c0_15] : memref<16x32xf32, #tpu.memory_space<vmem>>, vector<16x32xf32>
      tpu.vector_store %arg6[%c0_14, %c0_15], %17 {strides = array<i32>} : memref<16x32xf32, #tpu.memory_space<vmem>>, vector<16x32xf32>,
    } else {
    }
    return
  }
  func.func @transform_0(%arg0: i32, %arg1: i32, %arg2: i32) -> (i32, i32) {
    %c0_i32 = arith.constant 0 : i32
    return %arg0, %arg2 : i32, i32
  }
  func.func @transform_1(%arg0: i32, %arg1: i32, %arg2: i32) -> (i32, i32) {
    %c0_i32 = arith.constant 0 : i32
    return %arg2, %arg1 : i32, i32
  }
  func.func @transform_2(%arg0: i32, %arg1: i32, %arg2: i32) -> (i32, i32) {
    %c0_i32 = arith.constant 0 : i32
    %c0_i32_0 = arith.constant 0 : i32
    return %c0_i32, %arg1 : i32, i32
  }
  func.func @transform_3(%arg0: i32, %arg1: i32, %arg2: i32) -> (i32, i32) {
    %c0_i32 = arith.constant 0 : i32
    return %arg0, %arg1 : i32, i32
  }
}

</mosaic_0001>

<bundles_post_ra>
// kernel: tpu_custom_call.1
= control target key start
LH: loop header
LB: loop body
LE: loop exit
PB: predicated region body
PF: predicated region fallthrough
CT: control target
= control target key end

     0   :  { %8 = vsyncpa [#allocation4], 0  ;;  %s261_s0 = inlined_call_operand.hbm [shape: f32[16,32], index: 0, kind: input, shape index: {}]   ;;  %s262_s1 = inlined_call_operand.hbm [shape: f32[32,32], index: 1, kind: input, shape index: {}]   ;;  %s263_s2 = inlined_call_operand.vmem [shape: f32[1,32], index: 2, kind: input, shape index: {}]   ;;  %s264_s3 = inlined_call_operand.hbm [shape: f32[16,32], index: 3, kind: output, shape index: {}]  }
   0x1   :  { %9 = vsyncpa [#allocation7], 0 }
   0x2   :  { %10 = vsyncpa [#allocation5], 0  ;;  %s15_s14 = sshll.u32 %s261_s0, 4  ;;  %s207_s15 = smov [#allocation3]   ;;  %s16_s14 = int_to_ptr.hbm [resolvable:$true] %s15_s14 }
   0x3   :  { %s17_s16 = sshll.u32 %s207_s15, 4  ;;  %s28_s19 = sshll.u32 %s262_s1, 4  ;;  %s18_s16 = int_to_ptr.vmem [resolvable:$true] %s17_s16  ;;  %s29_s19 = int_to_ptr.hbm [resolvable:$true] %s28_s19 }
   0x4   :  { %s208_s20 = smov 128   ;;  %s209_s21 = smov 8  }
   0x5   :  { %23 = dma.hbm_to_vmem [thread:$0]  %s16_s14, 256, %s18_s16, [#allocation4], %s208_s20, %s208_s20, %s209_s21  }
   0x6   :  { %s210_s22 = smov [#allocation6]  }
   0x7   :  { %s30_s23 = sshll.u32 %s210_s22, 4  ;;  %s31_s23 = int_to_ptr.vmem [resolvable:$true] %s30_s23 }
   0x8   :  { %36 = dma.hbm_to_vmem [thread:$0]  %s29_s19, 512, %s31_s23, [#allocation7], %s208_s20, %s208_s20, %s209_s21  }
   0x9   :  { %201 = dma.done.wait [#allocation4], 256  }
   0xa   :  { %202 = vsyncadd [#allocation4], 4294967040 }
   0xb   :  { %203 = dma.done.wait [#allocation7], 512  }
   0xc   :  { %204 = vsyncadd [#allocation7], 4294966784  ;;  %vm52_vm0 = vcmask 261120   ;;  %v211_v0 = vmov 0.0   ;;  %v62_v1 = vld [vmem:[#allocation6 + $0x10] sm:$0xff]  ;;  %v63_v2 = vld [vmem:[#allocation6 + $0x18] sm:$0xff] }
   0xd   :  { %53 = vst.msk [vmem:[#allocation2] sm:$0xff] %vm52_vm0, %v211_v0  ;;  %v60_v3 = vld [vmem:[#allocation6] sm:$0xff]  ;;  %v65_v4 = vpack.c.bf16 %v63_v2, %v62_v1  ;;  %v61_v5 = vld [vmem:[#allocation6 + $0x8] sm:$0xff]  ;;  %v57_v7 = vld [vmem:[#allocation3] sm:$0xff]  ;;  %s212_s24 = smov [#allocation8]   ;;  %s107_s28 = sshll.u32 %s264_s3, 4  ;;  %s108_s28 = int_to_ptr.hbm [resolvable:$true] %s107_s28 }
   0xe   :  { %54 = vst.msk [vmem:[#allocation2 + $0x8] sm:$0xff] %vm52_vm0, %v211_v0  ;;  %v64_v6 = vpack.c.bf16 %v61_v5, %v60_v3  ;;  %v58_v8 = vld [vmem:[#allocation3 + $0x8] sm:$0xff]  ;;  %v128_v14 = vld [vmem:[%s263_s2] ss:$0 sm:$0xff]  ;;  %s105_s25 = sshll.u32 %s212_s24, 4  ;;  %s106_s25 = int_to_ptr.vmem [resolvable:$true] %s105_s25 }
   0xf   :  { %76 = vmatpush.bf16.msra.mxu0 %v65_v4  ;;  %v59_v9 = vpack.c.bf16 %v58_v8, %v57_v7 }
  0x13   :  { %77 = vmatpush.bf16.msra.mxu0 %v64_v6 }
  0x14   :  { %v55_v10 = vld [vmem:[#allocation2] sm:$0xff] }
  0x15   :  { %v56_v13 = vld [vmem:[#allocation2 + $0x8] sm:$0xff] }
  0x16   :  { %121 = vmatmul.msk.bf16.vlgmr.msra.gmra.mxu0 %vm52_vm0, %v59_v9 }
  0x93   :  { %v79_v11 = vpop.f32.mrf.mxu0 }
  0x94   :  { %v84_v12 = vadd.f32 %v79_v11, %v55_v10 }
  0x96   :  { %86 = vst.msk [vmem:[#allocation2] sm:$0xff] %vm52_vm0, %v84_v12 }
  0x9b   :  { %v81_v15 = vpop.f32.mrf.mxu0 }
  0x9c   :  { %v85_v16 = vadd.f32 %v81_v15, %v56_v13 }
  0x9d   :  { %v91_v17 = vld [vmem:[#allocation2] sm:$0xff] }
  0x9e   :  { %87 = vst.msk [vmem:[#allocation2 + $0x8] sm:$0xff] %vm52_vm0, %v85_v16  ;;  %v97_v18 = vadd.f32 %v128_v14, %v91_v17 }
  0xa0   :  { %99 = vst.msk [vmem:[#allocation8] sm:$0xff] %vm52_vm0, %v97_v18 }
  0xa5   :  { %v92_v19 = vld [vmem:[#allocation2 + $0x8] sm:$0xff] }
  0xa6   :  { %v98_v20 = vadd.f32 %v128_v14, %v92_v19 }
  0xa8   :  { %100 = vst.msk [vmem:[#allocation8 + $0x8] sm:$0xff] %vm52_vm0, %v98_v20 }
  0xa9   :  { %113 = dma.vmem_to_hbm [thread:$0]  %s106_s25, 256, %s108_s28, [#allocation5], %s208_s20, %s208_s20, %s209_s21  }
  0xaa   :  { %205 = dma.done.wait [#allocation5], 256  }
  0xab   :  { %206 = vsyncadd [#allocation5], 4294967040 }
  0xac   :  { %118 = vsyncpa [#allocation4], 1 }
  0xad   :  { %119 = vsyncpa [#allocation7], 1 }
  0xae   :  { %120 = vsyncpa [#allocation5], 1 }

</bundles_post_ra>
